<compile_context>
chip_gen: v6e
topology: v6e:2x2x1
jax: 0.10.0
libtpu: 0.0.40
codegen_flags: <defaults>
</compile_context>

<pallas_src>
import functools

import jax
import jax.numpy as jnp
from jax.experimental import pallas as pl
from jax.experimental.pallas import tpu as pltpu


# ---------------------------------------------------------------------------
# pltpu.roll shift-sign convention guard (one tiny compiled kernel, run once)
# ---------------------------------------------------------------------------
def _roll_probe_kernel(x_ref, o_ref):
    o_ref[...] = pltpu.roll(x_ref[...], 1, 0)


@functools.lru_cache(maxsize=None)
def _roll_shift_sign() -> int:
    """Resolve pltpu.roll's shift-sign convention on the sublane axis.

    Returns -1 if pltpu.roll(x, k, 0)[i] == x[(i - k) % n] (np.roll
    convention; the forward tap x1[i+s] then needs shift = -s), else +1.
    Must be resolved outside jit (it is: main calls the wrapper un-jitted).
    """
    x = jnp.tile(jnp.arange(8, dtype=jnp.float32)[:, None], (1, 8))
    r = pl.pallas_call(
        _roll_probe_kernel,
        out_shape=jax.ShapeDtypeStruct((8, 8), jnp.float32),
    )(x)
    v = int(r[1, 0])
    if v == 0:
        return -1
    if v == 2:
        return 1
    raise RuntimeError(f"unexpected pltpu.roll semantics (probe value {v})")


# ---------------------------------------------------------------------------
# Pass 1: bottleneck + fused inception branches + per-tile BN partial stats
# ---------------------------------------------------------------------------
def make_branch_kernel(T: int, pmax: int, B: int, kmax: int, roll_sign: int):
    Kz = (kmax + 1) * B

    def kernel(x_ref, w1_ref, wbig_ref, y_ref, stats_ref):
        TM = x_ref.shape[0]                       # whole-sample row tile

        # 1x1 bottleneck conv: one MXU matmul, bf16 operands, f32 accumulate.
        x1 = jnp.dot(x_ref[...], w1_ref[...],
                     preferred_element_type=jnp.float32)          # (TM, B)

        # Per-row time index within its sample (tiles hold whole samples,
        # rows are n*T + t).
        t = jax.lax.broadcasted_iota(jnp.int32, (TM, 1), 0) % T

        # Temporal taps x1[r + s] via XLU rotates -- no VMEM scratch staging.
        # Cyclic wrap / cross-sample bleed rows are discarded by the masks
        # below (keep them as selects, never multiply-by-mask).
        taps = {0: x1}
        for s in range(-pmax, pmax + 1):
            if s != 0:
                taps[s] = pltpu.roll(x1, (roll_sign * s) % TM, 0)

        # MaxPool2d((3,1), stride 1, pad (1,0)): -inf outside the sample.
        neg_inf = jnp.float32(-jnp.inf)
        xm = jnp.maximum(
            jnp.maximum(jnp.where(t - 1 >= 0, taps[-1], neg_inf), x1),
            jnp.where(t + 1 < T, taps[1], neg_inf))

        # im2col slab [tap(-pmax) .. tap(+pmax) | pooled]; ONE wide validity
        # select instead of 2*pmax narrow 8-lane ones.
        z = jnp.concatenate([taps[s] for s in range(-pmax, pmax + 1)] + [xm],
                            axis=1)                               # (TM, Kz)
        col = jax.lax.broadcasted_iota(jnp.int32, (1, Kz), 1)
        # per-column temporal shift (avoids in-kernel integer division)
        col_shift = jnp.full((1, Kz), -pmax, jnp.int32)
        for j in range(1, kmax):
            col_shift = col_shift + (col >= j * B).astype(jnp.int32)
        col_shift = jnp.where(col >= kmax * B, 0, col_shift)      # pooled: ok
        valid = jnp.logical_and(t + col_shift >= 0, t + col_shift < T)
        z = jnp.where(valid, z, 0.0)

        # Fused conv2/conv3/conv4 taps + pooled conv5 in ONE MXU matmul whose
        # columns are already the concat layout [y2|y3|y4|y5] zero-padded to
        # 128 lanes.  bf16 operands, f32 accumulation.  (Split per branch only
        # if this ever becomes MXU-bound at large F/B.)
        y = jnp.dot(z.astype(jnp.bfloat16), wbig_ref[...],
                    preferred_element_type=jnp.float32)           # (TM, OUTP)

        y_ref[...] = y.astype(y_ref.dtype)        # lane-dense staging store

        # Per-tile BatchNorm partials (mean + centered M2); combined exactly
        # across tiles in the wrapper (two-pass BN -> no full-array residency).
        tmean = jnp.mean(y, axis=0, keepdims=True)                # (1, OUTP)
        m2 = jnp.sum(jnp.square(y - tmean), axis=0, keepdims=True)
        stats_ref[...] = jnp.concatenate([tmean, m2], axis=0)[None, :, :]

    return kernel


# ---------------------------------------------------------------------------
# Pass 2: BN scale/shift + ReLU (elementwise, lane-dense)
# ---------------------------------------------------------------------------
def bn_relu_kernel(y_ref, scale_ref, shift_ref, o_ref):
    o_ref[...] = jnp.maximum(
        y_ref[...] * scale_ref[...] + shift_ref[...], 0.0).astype(o_ref.dtype)


# ---------------------------------------------------------------------------
# Weight packing
# ---------------------------------------------------------------------------
def _build_combined_weight(w2, w3, w4, w5, ks, out_pad):
    """Block weight ((kmax+1)*B, out_pad): per-shift conv2/3/4 taps + conv5.

    Row block j (shift s = j - pmax) holds tap s+p of each branch whose
    padding p covers that shift (zeros elsewhere); the last row block maps the
    max-pooled input through conv5.  Columns are already in the concat order
    [y2|y3|y4|y5], zero-padded to `out_pad` lanes.
    """
    F, B = w2.shape[0], w2.shape[1]
    kmax = max(ks)
    pmax = (kmax - 1) // 2
    wbig = jnp.zeros(((kmax + 1) * B, out_pad), jnp.float32)
    for br, (w, k) in enumerate(((w2, ks[0]), (w3, ks[1]), (w4, ks[2]))):
        p = (k - 1) // 2
        w_kbf = jnp.transpose(w[:, :, :, 0], (2, 1, 0))          # (k, B, F)
        for s in range(-p, p + 1):
            j = s + pmax
            wbig = wbig.at[j * B:(j + 1) * B,
                           br * F:(br + 1) * F].set(w_kbf[s + p])
    wbig = wbig.at[kmax * B:(kmax + 1) * B, 3 * F:4 * F].set(w5[:, :, 0, 0].T)
    return wbig


def _vmem_limit_bytes(block_bytes: int) -> int:
    # double-buffered blocks + headroom, capped below v7x's 64 MiB physical.
    need = 2 * block_bytes
    return int(min(48 * 2 ** 20, max(8 * 2 ** 20, 2 * need)))


# ---------------------------------------------------------------------------
# Wrapper
# ---------------------------------------------------------------------------
def inception_forward(x_nct, w1_oihw, w2_oihw, w3_oihw, w4_oihw, w5_oihw,
                      gamma, beta, ks, *, target_block_rows=512):
    """inception_module forward.

    x_nct: (N, in_maps, T) == the module's x.view(-1, in_maps, time_steps, 1).
    Returns (N, T, OUT_PAD) with OUT_PAD = 4*nb_filters rounded up to 128
    lanes; columns [0, 4*nb_filters) hold the result and the padded lanes are
    exactly 0 (slice in the consumer; keeping the padded layout end-to-end
    avoids an extra HBM read+write pass).
    """
    N, Cin, T = x_nct.shape
    assert Cin > 1, "in_maps == 1 (conv1 bypass) branch not implemented"
    B = w1_oihw.shape[0]
    F = w2_oihw.shape[0]
    assert all(k % 2 == 1 for k in ks), (
        "PyTorch padding (k+1)//2-1 equals 'same' only for odd kernel sizes")
    assert max(ks) >= 3, "max-pool branch needs +/-1 temporal neighbours"
    kmax = max(ks)
    pmax = (kmax - 1) // 2
    Kz = (kmax + 1) * B
    NT = N * T
    C4 = 4 * F
    out_pad = max(128, -(-C4 // 128) * 128)       # lane-dense output stores

    # Whole-sample row tiles (tap shifts + t-mask stay tile-local), targeting
    # >= target_block_rows rows per block at production sizes.
    spb = max(1, min(N, max(1, target_block_rows) // T))
    while N % spb:
        spb -= 1
    TM = spb * T
    if TM != NT and TM % 16:                      # bf16 input block sublanes
        TM = NT
    num_tiles = NT // TM

    roll_sign = _roll_shift_sign()                # resolved outside jit

    # bf16 MXU operands; accumulation stays f32 in-kernel.
    x2d = jnp.transpose(x_nct, (0, 2, 1)).reshape(NT, Cin).astype(jnp.bfloat16)
    w1 = w1_oihw[:, :, 0, 0].T.astype(jnp.bfloat16)               # (Cin, B)
    wbig = _build_combined_weight(w2_oihw, w3_oihw, w4_oihw, w5_oihw,
                                  ks, out_pad).astype(jnp.bfloat16)
    gamma_p = jnp.zeros((out_pad,), jnp.float32).at[:C4].set(gamma)
    beta_p = jnp.zeros((out_pad,), jnp.float32).at[:C4].set(beta)

    # ---- pass 1: branches + per-tile BN partials ---------------------------
    blk_bytes1 = (TM * Cin * 2 + Cin * B * 2 + Kz * out_pad * 2
                  + TM * out_pad * 4 + 2 * out_pad * 4)
    y, stats = pl.pallas_call(
        make_branch_kernel(T, pmax, B, kmax, roll_sign),
        out_shape=(jax.ShapeDtypeStruct((NT, out_pad), jnp.float32),
                   jax.ShapeDtypeStruct((num_tiles, 2, out_pad), jnp.float32)),
        grid=(num_tiles,),
        in_specs=[pl.BlockSpec((TM, Cin), lambda i: (i, 0)),
                  pl.BlockSpec((Cin, B), lambda i: (0, 0)),       # pinned
                  pl.BlockSpec((Kz, out_pad), lambda i: (0, 0))],  # pinned
        out_specs=(pl.BlockSpec((TM, out_pad), lambda i: (i, 0)),
                   pl.BlockSpec((1, 2, out_pad), lambda i: (i, 0, 0))),
        compiler_params=pltpu.CompilerParams(
            dimension_semantics=("parallel",),     # shard tiles across TCs
            vmem_limit_bytes=_vmem_limit_bytes(blk_bytes1)),
    )(x2d, w1, wbig)

    # ---- exact cross-tile BN stat combine (tiny, equal-sized tiles) --------
    tmeans, m2s = stats[:, 0, :], stats[:, 1, :]
    mean = jnp.mean(tmeans, axis=0)
    var = (jnp.sum(m2s, axis=0)
           + TM * jnp.sum(jnp.square(tmeans - mean[None, :]), axis=0)) / NT
    rstd = jax.lax.rsqrt(var + 1e-5)
    scale = (gamma_p * rstd)[None, :]              # zero on padded lanes
    shift = (beta_p - gamma_p * rstd * mean)[None, :]

    # ---- pass 2: y*scale + shift, ReLU --------------------------------------
    blk_bytes2 = 2 * TM * out_pad * 4 + 2 * out_pad * 4
    out = pl.pallas_call(
        bn_relu_kernel,
        out_shape=jax.ShapeDtypeStruct((NT, out_pad), jnp.float32),
        grid=(num_tiles,),
        in_specs=[pl.BlockSpec((TM, out_pad), lambda i: (i, 0)),
                  pl.BlockSpec((1, out_pad), lambda i: (0, 0)),
                  pl.BlockSpec((1, out_pad), lambda i: (0, 0))],
        out_specs=pl.BlockSpec((TM, out_pad), lambda i: (i, 0)),
        compiler_params=pltpu.CompilerParams(
            dimension_semantics=("parallel",),
            vmem_limit_bytes=_vmem_limit_bytes(blk_bytes2)),
    )(y, scale, shift)

    return out.reshape(N, T, out_pad)


# ---------------------------------------------------------------------------
# Pure-JAX mirror of the PyTorch module (NCHW, W==1), for verification
# ---------------------------------------------------------------------------
def torch_style_ref(x_nct, w1, w2, w3, w4, w5, ks, gamma, beta):
    xv = x_nct[:, :, :, None]
    prec = jax.lax.Precision.HIGHEST

    def conv(inp, w, pad_h):
        return jax.lax.conv_general_dilated(
            inp, w, window_strides=(1, 1),
            padding=((pad_h, pad_h), (0, 0)),
            dimension_numbers=("NCHW", "OIHW", "NCHW"),
            precision=prec)

    x1 = conv(xv, w1, 0)
    x2 = conv(x1, w2, (ks[0] + 1) // 2 - 1)
    x3 = conv(x1, w3, (ks[1] + 1) // 2 - 1)
    x4 = conv(x1, w4, (ks[2] + 1) // 2 - 1)
    xm = jax.lax.reduce_window(x1, -jnp.inf, jax.lax.max,
                               (1, 1, 3, 1), (1, 1, 1, 1),
                               ((0, 0), (0, 0), (1, 1), (0, 0)))
    x5 = conv(xm, w5, 0)
    cat = jnp.concatenate([x2, x3, x4, x5], axis=1)
    mean = cat.mean(axis=(0, 2, 3), keepdims=True)
    var = ((cat - mean) ** 2).mean(axis=(0, 2, 3), keepdims=True)
    y = (cat - mean) / jnp.sqrt(var + 1e-5)
    y = y * gamma[None, :, None, None] + beta[None, :, None, None]
    return jax.nn.relu(y)


if __name__ == "__main__":
    N, in_maps, T = 2, 4, 16
    bottleneck, nb_filters = 8, 8
    ks = (3, 5, 7)   # odd kernel sizes -> 'same' time length so concat is valid

    keys = jax.random.split(jax.random.PRNGKey(0), 8)
    # PyTorch input: views to (-1, in_maps, time_steps, 1)
    x = jax.random.normal(keys[0], (N, in_maps, T), jnp.float32)
    # Deterministic synthetic weights, PyTorch OIHW layout
    w1_oihw = 0.3 * jax.random.normal(keys[1], (bottleneck, in_maps, 1, 1), jnp.float32)
    w2_oihw = 0.2 * jax.random.normal(keys[2], (nb_filters, bottleneck, ks[0], 1), jnp.float32)
    w3_oihw = 0.2 * jax.random.normal(keys[3], (nb_filters, bottleneck, ks[1], 1), jnp.float32)
    w4_oihw = 0.2 * jax.random.normal(keys[4], (nb_filters, bottleneck, ks[2], 1), jnp.float32)
    w5_oihw = 0.3 * jax.random.normal(keys[5], (nb_filters, bottleneck, 1, 1), jnp.float32)
    gamma = jax.random.uniform(keys[6], (4 * nb_filters,), jnp.float32, 0.5, 1.5)
    beta = 0.1 * jax.random.normal(keys[7], (4 * nb_filters,), jnp.float32)

    # target_block_rows=T -> one sample per row tile, so a real 2-step
    # 'parallel' grid and the cross-tile BN stat combine are exercised even at
    # this toy size (default 512 picks the largest whole-sample tile).
    out_padded = inception_forward(x, w1_oihw, w2_oihw, w3_oihw, w4_oihw,
                                   w5_oihw, gamma, beta, ks,
                                   target_block_rows=T)
    out_padded = jax.block_until_ready(out_padded)

    C4 = 4 * nb_filters
    out = out_padded[..., :C4]                    # consumer-side lane slice

    # correctness check against the PyTorch-equivalent reference
    ref = torch_style_ref(x, w1_oihw, w2_oihw, w3_oihw, w4_oihw, w5_oihw,
                          ks, gamma, beta)
    ref_ntc = jnp.transpose(ref[:, :, :, 0], (0, 2, 1))          # (N, T, 4F)
    assert out.shape == (N, T, C4)
    # bf16 MXU operands (f32 accumulation) vs an f32 HIGHEST-precision
    # reference -> 5e-2 tolerance (structural errors would be O(1)).
    assert bool(jnp.allclose(out, ref_ntc, atol=5e-2, rtol=5e-2)), \
        "mismatch vs reference"
    assert bool(jnp.all(out_padded[..., C4:] == 0.0)), "padded lanes not zero"
    print("KERNEL_OK")
</pallas_src>

<mosaic_0001>
module attributes {stable_mosaic.version = 11 : i64} {
  func.func @_roll_probe_kernel(%arg0: memref<8x8xf32, #tpu.memory_space<vmem>>, %arg1: memref<8x8xf32, #tpu.memory_space<vmem>>) attributes {dimension_semantics = [], scalar_prefetch = 0 : i64, scratch_operands = 0 : i64, tpu.core_type = #tpu.core_type<tc>} {
    %c0 = arith.constant 0 : index
    %c0_0 = arith.constant 0 : index
    %0 = vector.load %arg0[%c0, %c0_0] : memref<8x8xf32, #tpu.memory_space<vmem>>, vector<8x8xf32>
    %c1_i32 = arith.constant 1 : i32
    %1 = tpu.dynamic_rotate %0 by %c1_i32 dim 0 : vector<8x8xf32>, i32 -> vector<8x8xf32>
    %c0_1 = arith.constant 0 : index
    %c0_2 = arith.constant 0 : index
    %2 = vector.load %arg1[%c0_1, %c0_2] : memref<8x8xf32, #tpu.memory_space<vmem>>, vector<8x8xf32>
    tpu.vector_store %arg1[%c0_1, %c0_2], %1 {strides = array<i32>} : memref<8x8xf32, #tpu.memory_space<vmem>>, vector<8x8xf32>,
    return
  }
}

</mosaic_0001>

<bundles_post_ra>
// kernel: tpu_custom_call.1
= control target key start
LH: loop header
LB: loop body
LE: loop exit
PB: predicated region body
PF: predicated region fallthrough
CT: control target
= control target key end

     0   :  { %6 = vsyncpa [#allocation3], 0  ;;  %s104_s0 = inlined_call_operand.hbm [shape: f32[8,8], index: 0, kind: input, shape index: {}]   ;;  %s105_s1 = inlined_call_operand.hbm [shape: f32[8,8], index: 1, kind: output, shape index: {}]  }
   0x1   :  { %7 = vsyncpa [#allocation4], 0  ;;  %s86_s6 = smov [#allocation2]  }
   0x2   :  { %s14_s7 = sshll.u32 %s86_s6, 4  ;;  %s15_s7 = int_to_ptr.vmem [resolvable:$true] %s14_s7 }
   0x3   :  { %s50_s8 = scalar_lea.vmem %s15_s7, 128  ;;  %p55_p1 = scmp.lt.s32.totalorder %s15_s7, %s15_s7 }
   0x4   :  { %p51_p0 = scmp.ne.s32.totalorder %s15_s7, %s50_s8  ;;  %p56_p2 = scmp.lt.s32.totalorder %s50_s8, %s50_s8 }
   0x6   :  { %p57_p3 = por %p56_p2, %p55_p1 }
   0x8   :  { %p58_p4 = pnand %p57_p3, %p51_p0 }
   0xa   :  { %61 = shalt.err (!%p58_p4)
}
   0xb   :  { %17 = dma.hbm_to_vmem [thread:$0]  %s104_s0, 128, %s15_s7, [#allocation3]  }
   0xc   :  { %82 = dma.done.wait [#allocation3], 128  }
   0xd   :  { %83 = vsyncadd [#allocation3], 4294967168  ;;  %s87_s11 = smov [#allocation5]   ;;  %v21_v0 = vld [vmem:[#allocation2] sm:$0xff]  ;;  %vm23_vm0 = vcmask 64512  }
   0xe   :  { %s31_s12 = sshll.u32 %s87_s11, 4  ;;  %v22_v1 = vrot.slane %v21_v0, 7  ;;  %s32_s12 = int_to_ptr.vmem [resolvable:$true] %s31_s12 }
   0xf   :  { %s62_s13 = scalar_lea.vmem %s32_s12, 128  ;;  %p67_p6 = scmp.lt.s32.totalorder %s32_s12, %s32_s12 }
  0x10   :  { %24 = vst.msk [vmem:[#allocation5] sm:$0xff] %vm23_vm0, %v22_v1  ;;  %p63_p5 = scmp.ne.s32.totalorder %s32_s12, %s62_s13  ;;  %p68_p7 = scmp.lt.s32.totalorder %s62_s13, %s62_s13 }
  0x12   :  { %p69_p8 = por %p68_p7, %p67_p6 }
  0x14   :  { %p70_p9 = pnand %p69_p8, %p63_p5 }
  0x16   :  { %73 = shalt.err (!%p70_p9)
}
  0x17   :  { %34 = dma.vmem_to_hbm [thread:$0]  %s32_s12, 128, %s105_s1, [#allocation4]  }
  0x18   :  { %84 = dma.done.wait [#allocation4], 128  }
  0x19   :  { %85 = vsyncadd [#allocation4], 4294967168 }
  0x1a   :  { %38 = vsyncpa [#allocation3], 1 }
  0x1b   :  { %39 = vsyncpa [#allocation4], 1 }

</bundles_post_ra>
